<compile_context>
chip_gen: v5e
topology: v5e:2x2
jax: 0.10.0
libtpu: 0.0.40
codegen_flags: <defaults>
</compile_context>

<pallas_src>
import functools

import jax
import jax.numpy as jnp
from jax.experimental import pallas as pl
from jax.experimental.pallas import tpu as pltpu

EPS = 1e-5


# ----------------------------- Pallas kernels ------------------------------
def _mask_rows(x, rows):
    """Zero rows whose global index is >= rows (tail tile of a cdiv grid)."""
    tm = x.shape[0]
    rid = jax.lax.broadcasted_iota(jnp.int32, (tm, 1), 0) + pl.program_id(0) * tm
    return jnp.where(rid < rows, x, jnp.zeros_like(x))


def _emit_stats(st_ref, y):
    st_ref[0, 0:1, :] = jnp.sum(y, axis=0, keepdims=True)
    st_ref[0, 1:2, :] = jnp.sum(y * y, axis=0, keepdims=True)


def stats1_kernel(x_ref, w1_ref, st1_ref, *, rows, masked):
    """conv1 (1x1) on a row tile; emit per-tile partial BN-1 statistics."""
    x = x_ref[...]
    if masked:
        x = _mask_rows(x, rows)
    _emit_stats(st1_ref, jnp.dot(x, w1_ref[...], preferred_element_type=jnp.float32))


def stats1_proj_kernel(x_ref, w1_ref, ws_ref, st1_ref, sts_ref, *, rows, masked):
    """conv1 + projection-shortcut conv on the same x tile (one x DMA)."""
    x = x_ref[...]
    if masked:
        x = _mask_rows(x, rows)
    _emit_stats(st1_ref, jnp.dot(x, w1_ref[...], preferred_element_type=jnp.float32))
    _emit_stats(sts_ref, jnp.dot(x, ws_ref[...], preferred_element_type=jnp.float32))


def stats_sc_kernel(xs_ref, ws_ref, sts_ref, *, rows, masked):
    """Shortcut-conv BN stats over strided x rows (stride > 1 only)."""
    xs = xs_ref[...]
    if masked:
        xs = _mask_rows(xs, rows)
    _emit_stats(sts_ref, jnp.dot(xs, ws_ref[...], preferred_element_type=jnp.float32))


def stats3_kernel(y2_ref, w3_ref, s2_ref, b2_ref, st3_ref, *, rows, masked):
    """BN2-apply + conv3 on a row tile; emit partial BN-3 statistics."""
    a2 = jnp.maximum(y2_ref[...].astype(jnp.float32) * s2_ref[...] + b2_ref[...], 0.0)
    if masked:
        a2 = _mask_rows(a2, rows)
    y3 = jnp.dot(a2.astype(w3_ref.dtype), w3_ref[...],
                 preferred_element_type=jnp.float32)
    _emit_stats(st3_ref, y3)


def conv2_kernel(xpad_ref, w1_ref, s1_ref, b1_ref, wmask_ref, w2_ref,
                 y2_ref, st2_ref, a1_scr, acc_scr, *, H, W, stride, lead):
    """Per image: conv1+BN1+ReLU into a flattened, width-padded VMEM scratch,
    then the 3x3 conv as nine whole-image shifted-slab matmuls.  Emits y2 and
    partial BN-2 statistics.  No im2col array ever touches HBM."""
    Wp = W + 2
    HWp = H * Wp
    Ho, Wo = y2_ref.shape[1], y2_ref.shape[2]
    P = w1_ref.shape[1]
    S = a1_scr.shape[0]

    # Zero only the top/bottom halo rows (interior is fully overwritten below;
    # interior pad columns are zeroed via wmask).
    a1_scr[pl.ds(0, lead), :] = jnp.zeros((lead, P), a1_scr.dtype)
    tail = S - (lead + HWp)
    a1_scr[pl.ds(lead + HWp, tail), :] = jnp.zeros((tail, P), a1_scr.dtype)

    # conv1 + BN1 + ReLU for the whole image as ONE MXU matmul (M = H*(W+2)).
    y1 = jnp.dot(xpad_ref[0], w1_ref[...], preferred_element_type=jnp.float32)
    a1 = jnp.maximum(y1 * s1_ref[...] + b1_ref[...], 0.0) * wmask_ref[...]
    a1_scr[pl.ds(lead, HWp), :] = a1.astype(a1_scr.dtype)

    # 3x3 conv: nine whole-image tap matmuls on the flattened padded scratch.
    # Each tap is a contiguous slab at a static offset; junk rows (at the pad
    # columns) are never extracted.
    # TODO(synk): merge the three kx taps per ky into one K=3P matmul.
    acc = None
    for ky in range(3):
        for kx in range(3):
            off = lead - Wp + ky * Wp + kx
            tap = a1_scr[pl.ds(off, HWp), :]
            d = jnp.dot(tap, w2_ref[ky * 3 + kx], preferred_element_type=jnp.float32)
            acc = d if acc is None else acc + d
    acc_scr[...] = acc

    # Extract the valid (Ho, Wo) rows from the dense padded-layout accumulator.
    for ho in range(Ho):
        src = stride * ho * Wp
        if stride == 1:
            row = acc_scr[pl.ds(src, Wo), :]
        else:
            # TODO(synk): stride>1 computes the dense conv then subsamples;
            # the strided-sublane read below is not exercised by the self-test.
            row = acc_scr[pl.ds(src, Wo, stride=stride), :]
        y2_ref[0, ho] = row.astype(y2_ref.dtype)

    # BN-2 partial statistics on the stored (compute-dtype) y2 tile.
    y2blk = y2_ref[0].astype(jnp.float32)
    st2_ref[0, 0:1, :] = jnp.sum(y2blk, axis=(0, 1), keepdims=True)[0]
    st2_ref[0, 1:2, :] = jnp.sum(y2blk * y2blk, axis=(0, 1), keepdims=True)[0]


def apply_proj_kernel(y2_ref, xs_ref, w3_ref, s2_ref, b2_ref, s3_ref, b3_ref,
                      ws_ref, ss_ref, bs_ref, o_ref):
    """Final row-tile pass: BN2+ReLU, conv3, BN3, projection shortcut, ReLU."""
    a2 = jnp.maximum(y2_ref[...].astype(jnp.float32) * s2_ref[...] + b2_ref[...], 0.0)
    y3 = jnp.dot(a2.astype(w3_ref.dtype), w3_ref[...],
                 preferred_element_type=jnp.float32)
    o3 = y3 * s3_ref[...] + b3_ref[...]
    ys = jnp.dot(xs_ref[...], ws_ref[...], preferred_element_type=jnp.float32)
    sc = ys * ss_ref[...] + bs_ref[...]
    o_ref[...] = jnp.maximum(o3 + sc, 0.0).astype(o_ref.dtype)


def apply_id_kernel(y2_ref, sc_ref, w3_ref, s2_ref, b2_ref, s3_ref, b3_ref, o_ref):
    """Final row-tile pass with identity shortcut (shortcut read in compute
    dtype and upcast here; no dead projection arguments)."""
    a2 = jnp.maximum(y2_ref[...].astype(jnp.float32) * s2_ref[...] + b2_ref[...], 0.0)
    y3 = jnp.dot(a2.astype(w3_ref.dtype), w3_ref[...],
                 preferred_element_type=jnp.float32)
    o3 = y3 * s3_ref[...] + b3_ref[...]
    o_ref[...] = jnp.maximum(o3 + sc_ref[...].astype(jnp.float32), 0.0).astype(o_ref.dtype)


# ------------------------------ JAX glue -----------------------------------
def _fold_bn(partial_stats, count, gamma, beta):
    """Fold per-tile (sum, sum_sq) partials into per-channel (scale, bias)."""
    s = jnp.sum(partial_stats, axis=0)                     # (2, C) in f32
    mu = s[0] / count
    var = jnp.maximum(s[1] / count - mu * mu, 0.0)         # clamp cancellation
    scale = gamma * jax.lax.rsqrt(var + EPS)
    bias = beta - mu * scale
    return scale.reshape(1, -1), bias.reshape(1, -1)


def _tiles(m, row_tile):
    """Row-tile size, grid size, and whether the last tile is partial."""
    if m <= row_tile:
        return m, 1, False
    tm = max(16, row_tile - row_tile % 16)
    return tm, pl.cdiv(m, tm), (m % tm != 0)


def _hw_budget():
    """(vmem_limit_bytes, default row_tile) tuned per TPU generation."""
    cap = 0
    try:
        cap = int(pltpu.get_tpu_info().vmem_capacity_bytes)
    except Exception:
        cap = 0
    if cap >= 100 * 1024 * 1024:            # v5e / v6e class: 128 MiB VMEM
        return 96 * 1024 * 1024, 2048
    return 48 * 1024 * 1024, 1024           # v7x class (64 MiB) / unknown


def _row_spec(tm, c):
    return pl.BlockSpec((tm, c), lambda g: (g, 0))


def _rep0(shape):
    return pl.BlockSpec(shape, lambda *_: (0,) * len(shape))


def _st_spec(c):
    return pl.BlockSpec((1, 2, c), lambda g: (g, 0, 0))


def bottleneck_forward(x_nchw, params, *, planes, stride=1,
                       compute_dtype=jnp.bfloat16, row_tile=None):
    N, Cin, H, W = x_nchw.shape
    P, E = planes, 4 * planes
    Ho = (H - 1) // stride + 1
    Wo = (W - 1) // stride + 1
    cd = compute_dtype
    Wp = W + 2
    HWp = H * Wp
    lead = -(-Wp // 16) * 16                # aligned start of the conv1 rows
    S = lead + HWp + Wp + 8                 # padded-scratch rows (flat layout)

    vmem_limit, auto_tile = _hw_budget()
    if row_tile is None:
        row_tile = auto_tile
    cp = pltpu.CompilerParams(dimension_semantics=("parallel",),
                              vmem_limit_bytes=vmem_limit)

    # Single NHWC copy of x in compute dtype (no separate f32 NHWC copy).
    x_c = jnp.transpose(x_nchw, (0, 2, 3, 1)).astype(cd)
    x2d = x_c.reshape(N * H * W, Cin)
    # Width-padded, flattened copy for the fused conv1 + 3x3 pass.
    xpad = jnp.pad(x_c, ((0, 0), (0, 0), (1, 1), (0, 0))).reshape(N, HWp, Cin)
    # Interior-column mask: zeroes the two pad columns after BN1+ReLU.
    col = jnp.arange(HWp, dtype=jnp.int32) % Wp
    wmask = ((col >= 1) & (col <= W)).astype(jnp.float32).reshape(HWp, 1)

    # PyTorch OIHW conv weights -> matmul layouts (compute dtype for the MXU).
    w1 = params["w1_t"][:, :, 0, 0].T.astype(cd)                               # (Cin, P)
    w2 = jnp.transpose(params["w2_t"], (2, 3, 1, 0)).reshape(9, P, P).astype(cd)
    w3 = params["w3_t"][:, :, 0, 0].T.astype(cd)                               # (P, E)
    f32 = lambda v: v.astype(jnp.float32)

    has_proj = (stride != 1) or (Cin != E)
    M1 = N * H * W
    M2 = N * Ho * Wo
    TM1, G1, mask1 = _tiles(M1, row_tile)
    TM2, G2, mask2 = _tiles(M2, row_tile)

    # ---- Pass 1: BN-1 stats (+ projection-shortcut stats when it can reuse
    # the same x rows, i.e. stride == 1). ----
    sts = None
    if has_proj:
        ws = params["ws_t"][:, :, 0, 0].T.astype(cd)                           # (Cin, E)
    if has_proj and stride == 1:
        st1, sts = pl.pallas_call(
            functools.partial(stats1_proj_kernel, rows=M1, masked=mask1),
            grid=(G1,),
            in_specs=[_row_spec(TM1, Cin), _rep0((Cin, P)), _rep0((Cin, E))],
            out_specs=(_st_spec(P), _st_spec(E)),
            out_shape=(jax.ShapeDtypeStruct((G1, 2, P), jnp.float32),
                       jax.ShapeDtypeStruct((G1, 2, E), jnp.float32)),
            compiler_params=cp,
        )(x2d, w1, ws)
    else:
        st1 = pl.pallas_call(
            functools.partial(stats1_kernel, rows=M1, masked=mask1),
            grid=(G1,),
            in_specs=[_row_spec(TM1, Cin), _rep0((Cin, P))],
            out_specs=_st_spec(P),
            out_shape=jax.ShapeDtypeStruct((G1, 2, P), jnp.float32),
            compiler_params=cp,
        )(x2d, w1)
    scale1, bias1 = _fold_bn(st1, M1, f32(params["g1"]), f32(params["b1"]))

    # ---- Pass 2: fused conv1+BN1+ReLU + 3x3 conv (per image) + BN-2 stats. ----
    # TODO(synk): split grid to (N, row-blocks) with halo index_maps for v7x.
    y2_img, st2 = pl.pallas_call(
        functools.partial(conv2_kernel, H=H, W=W, stride=stride, lead=lead),
        grid=(N,),
        in_specs=[pl.BlockSpec((1, HWp, Cin), lambda n: (n, 0, 0)),
                  _rep0((Cin, P)), _rep0((1, P)), _rep0((1, P)),
                  _rep0((HWp, 1)), _rep0((9, P, P))],
        out_specs=(pl.BlockSpec((1, Ho, Wo, P), lambda n: (n, 0, 0, 0)),
                   pl.BlockSpec((1, 2, P), lambda n: (n, 0, 0))),
        out_shape=(jax.ShapeDtypeStruct((N, Ho, Wo, P), cd),
                   jax.ShapeDtypeStruct((N, 2, P), jnp.float32)),
        scratch_shapes=[pltpu.VMEM((S, P), cd),
                        pltpu.VMEM((HWp, P), jnp.float32)],
        compiler_params=cp,
    )(xpad, w1, scale1, bias1, wmask, w2)
    scale2, bias2 = _fold_bn(st2, M2, f32(params["g2"]), f32(params["b2"]))
    y2 = y2_img.reshape(M2, P)

    # ---- Pass 3: BN-3 stats (row-tiled over y2). ----
    st3 = pl.pallas_call(
        functools.partial(stats3_kernel, rows=M2, masked=mask2),
        grid=(G2,),
        in_specs=[_row_spec(TM2, P), _rep0((P, E)), _rep0((1, P)), _rep0((1, P))],
        out_specs=_st_spec(E),
        out_shape=jax.ShapeDtypeStruct((G2, 2, E), jnp.float32),
        compiler_params=cp,
    )(y2, w3, scale2, bias2)
    scale3, bias3 = _fold_bn(st3, M2, f32(params["g3"]), f32(params["b3"]))

    # ---- Pass 4: apply (BN2+ReLU, conv3, BN3, shortcut, add, ReLU). ----
    if has_proj:
        xs = x2d if stride == 1 else x_c[:, ::stride, ::stride, :].reshape(M2, Cin)
        if sts is None:       # stride > 1: dedicated shortcut-stats pass over xs
            sts = pl.pallas_call(
                functools.partial(stats_sc_kernel, rows=M2, masked=mask2),
                grid=(G2,),
                in_specs=[_row_spec(TM2, Cin), _rep0((Cin, E))],
                out_specs=_st_spec(E),
                out_shape=jax.ShapeDtypeStruct((G2, 2, E), jnp.float32),
                compiler_params=cp,
            )(xs, ws)
        scales, biass = _fold_bn(sts, M2, f32(params["gs"]), f32(params["bs"]))
        out2d = pl.pallas_call(
            apply_proj_kernel,
            grid=(G2,),
            in_specs=[_row_spec(TM2, P), _row_spec(TM2, Cin),
                      _rep0((P, E)), _rep0((1, P)), _rep0((1, P)),
                      _rep0((1, E)), _rep0((1, E)),
                      _rep0((Cin, E)), _rep0((1, E)), _rep0((1, E))],
            out_specs=_row_spec(TM2, E),
            out_shape=jax.ShapeDtypeStruct((M2, E), cd),
            compiler_params=cp,
        )(y2, xs, w3, scale2, bias2, scale3, bias3, ws, scales, biass)
    else:
        out2d = pl.pallas_call(
            apply_id_kernel,
            grid=(G2,),
            in_specs=[_row_spec(TM2, P), _row_spec(TM2, E),
                      _rep0((P, E)), _rep0((1, P)), _rep0((1, P)),
                      _rep0((1, E)), _rep0((1, E))],
            out_specs=_row_spec(TM2, E),
            out_shape=jax.ShapeDtypeStruct((M2, E), cd),
            compiler_params=cp,
        )(y2, x2d, w3, scale2, bias2, scale3, bias3)

    # Output stays in compute dtype; NHWC->NCHW transpose runs on the narrow
    # tensor (consumers wanting f32 can upcast).
    return jnp.transpose(out2d.reshape(N, Ho, Wo, E), (0, 3, 1, 2))


# ------------------------ pure-JAX reference (check) ------------------------
def ref_forward(x, p, *, stride=1):
    def conv(x, w, stride=1, pad=0):
        return jax.lax.conv_general_dilated(
            x, w, window_strides=(stride, stride),
            padding=[(pad, pad), (pad, pad)],
            dimension_numbers=("NCHW", "OIHW", "NCHW"))

    def bn(y, gamma, beta):
        mu = jnp.mean(y, axis=(0, 2, 3), keepdims=True)
        var = jnp.mean((y - mu) ** 2, axis=(0, 2, 3), keepdims=True)
        return ((y - mu) * jax.lax.rsqrt(var + EPS)
                * gamma.reshape(1, -1, 1, 1) + beta.reshape(1, -1, 1, 1))

    E = p["w3_t"].shape[0]
    out = jax.nn.relu(bn(conv(x, p["w1_t"]), p["g1"], p["b1"]))
    out = jax.nn.relu(bn(conv(out, p["w2_t"], stride=stride, pad=1), p["g2"], p["b2"]))
    out = bn(conv(out, p["w3_t"]), p["g3"], p["b3"])
    if stride != 1 or x.shape[1] != E:
        sc = bn(conv(x, p["ws_t"], stride=stride), p["gs"], p["bs"])
    else:
        sc = x
    return jax.nn.relu(out + sc)


# ------------------------------- params ------------------------------------
def init_params(key, in_planes, planes):
    E = 4 * planes
    ks = jax.random.split(key, 12)
    n = lambda k, shp, s=0.1: s * jax.random.normal(k, shp, jnp.float32)
    return dict(
        w1_t=n(ks[0], (planes, in_planes, 1, 1)),
        g1=1.0 + n(ks[1], (planes,)), b1=n(ks[2], (planes,)),
        w2_t=n(ks[3], (planes, planes, 3, 3)),
        g2=1.0 + n(ks[4], (planes,)), b2=n(ks[5], (planes,)),
        w3_t=n(ks[6], (E, planes, 1, 1)),
        g3=1.0 + n(ks[7], (E,)), b3=n(ks[8], (E,)),
        ws_t=n(ks[9], (E, in_planes, 1, 1)),
        gs=1.0 + n(ks[10], (E,)), bs=n(ks[11], (E,)),
    )


if __name__ == "__main__":
    key = jax.random.PRNGKey(0)
    kx1, kp1, kx2, kp2 = jax.random.split(key, 4)

    # Config A: projection shortcut, bf16 MXU path, masked tail tiles
    # (512 rows with row_tile=96 exercises the cdiv + tail-mask path).
    N, Cin, H, W, planes = 2, 4, 16, 16, 4
    x = jax.random.normal(kx1, (N, Cin, H, W), jnp.float32)
    p = init_params(kp1, Cin, planes)
    out = jax.block_until_ready(
        bottleneck_forward(x, p, planes=planes, stride=1,
                           compute_dtype=jnp.bfloat16, row_tile=96))
    ref = ref_forward(x, p, stride=1)
    assert out.shape == ref.shape == (N, 4 * planes, H, W)
    out_f = out.astype(jnp.float32)
    assert bool(jnp.allclose(out_f, ref, atol=1e-1, rtol=1e-1)), \
        float(jnp.max(jnp.abs(out_f - ref)))

    # Config B: identity shortcut, f32 path, tight check, masked tails too.
    Cin_b = 4 * planes
    xb = jax.random.normal(kx2, (N, Cin_b, H, W), jnp.float32)
    pb = init_params(kp2, Cin_b, planes)
    outb = jax.block_until_ready(
        bottleneck_forward(xb, pb, planes=planes, stride=1,
                           compute_dtype=jnp.float32, row_tile=96))
    refb = ref_forward(xb, pb, stride=1)
    assert outb.shape == refb.shape == (N, 4 * planes, H, W)
    assert bool(jnp.allclose(outb, refb, atol=5e-3, rtol=5e-3)), \
        float(jnp.max(jnp.abs(outb - refb)))

    print("KERNEL_OK")
</pallas_src>

<mosaic_0001>
module attributes {stable_mosaic.version = 11 : i64} {
  func.func @stats1_proj_kernel(%arg0: i32, %arg1: memref<96x4xbf16, #tpu.memory_space<vmem>>, %arg2: memref<4x4xbf16, #tpu.memory_space<vmem>>, %arg3: memref<4x16xbf16, #tpu.memory_space<vmem>>, %arg4: memref<1x2x4xf32, #tpu.memory_space<vmem>>, %arg5: memref<1x2x16xf32, #tpu.memory_space<vmem>>) attributes {dimension_semantics = [#tpu.dimension_semantics<parallel>], iteration_bounds = array<i64: 6>, scalar_prefetch = 0 : i64, scratch_operands = 0 : i64, tpu.core_type = #tpu.core_type<tc>, window_params = [{transform_indices = @transform_0, window_bounds = array<i64: 96, 4>}, {pipeline_mode = #tpu.pipeline_mode<synchronous>, transform_indices = @transform_1, window_bounds = array<i64: 4, 4>}, {pipeline_mode = #tpu.pipeline_mode<synchronous>, transform_indices = @transform_2, window_bounds = array<i64: 4, 16>}, {transform_indices = @transform_3, window_bounds = array<i64: 1, 2, 4>}, {transform_indices = @transform_4, window_bounds = array<i64: 1, 2, 16>}]} {
    %c0 = arith.constant 0 : index
    %c0_0 = arith.constant 0 : index
    %0 = vector.load %arg1[%c0, %c0_0] : memref<96x4xbf16, #tpu.memory_space<vmem>>, vector<96x4xbf16>
    %1 = tpu.iota {dimensions = array<i32: 0>} : vector<96x1xi32>
    %c96_i32 = arith.constant 96 : i32
    %2 = arith.muli %arg0, %c96_i32 : i32
    %3 = vector.broadcast %2 : i32 to vector<96x1xi32>
    %4 = arith.addi %1, %3 : vector<96x1xi32>
    %c512_i32 = arith.constant 512 : i32
    %5 = vector.broadcast %c512_i32 : i32 to vector<96x1xi32>
    %6 = arith.cmpi slt, %4, %5 : vector<96x1xi32>
    %cst = arith.constant 0.000000e+00 : bf16
    %7 = vector.broadcast %cst : bf16 to vector<96x4xbf16>
    %8 = vector.shape_cast %6 : vector<96x1xi1> to vector<96x1xi1>
    %9 = vector.broadcast %8 : vector<96x1xi1> to vector<96x4xi1>
    %10 = arith.select %9, %0, %7 : vector<96x4xi1>, vector<96x4xbf16>
    %c0_1 = arith.constant 0 : index
    %c0_2 = arith.constant 0 : index
    %11 = vector.load %arg2[%c0_1, %c0_2] : memref<4x4xbf16, #tpu.memory_space<vmem>>, vector<4x4xbf16>
    %cst_3 = arith.constant dense<0.000000e+00> : vector<96x4xf32>
    %12 = tpu.matmul %10, %11, %cst_3 {dimension_numbers = #tpu.dot_dimension_numbers<[1], [0], [0], [1], [0, 0, 1, 1], [], []>} : vector<96x4xbf16>, vector<4x4xbf16>, vector<96x4xf32> -> vector<96x4xf32>
    %cst_4 = arith.constant dense<0.000000e+00> : vector<4xf32>
    %13 = vector.multi_reduction <add>, %12, %cst_4 [0] : vector<96x4xf32> to vector<4xf32>
    %14 = vector.shape_cast %13 : vector<4xf32> to vector<1x4xf32>
    %c0_5 = arith.constant 0 : index
    %c0_6 = arith.constant 0 : index
    %c0_7 = arith.constant 0 : index
    %15 = vector.load %arg4[%c0_5, %c0_6, %c0_7] : memref<1x2x4xf32, #tpu.memory_space<vmem>>, vector<1x1x4xf32>
    %16 = vector.shape_cast %15 : vector<1x1x4xf32> to vector<1x4xf32>
    %17 = vector.shape_cast %14 : vector<1x4xf32> to vector<1x1x4xf32>
    tpu.vector_store %arg4[%c0_5, %c0_6, %c0_7], %17 {strides = array<i32>} : memref<1x2x4xf32, #tpu.memory_space<vmem>>, vector<1x1x4xf32>,
    %18 = arith.mulf %12, %12 : vector<96x4xf32>
    %cst_8 = arith.constant dense<0.000000e+00> : vector<4xf32>
    %19 = vector.multi_reduction <add>, %18, %cst_8 [0] : vector<96x4xf32> to vector<4xf32>
    %20 = vector.shape_cast %19 : vector<4xf32> to vector<1x4xf32>
    %c0_9 = arith.constant 0 : index
    %c1 = arith.constant 1 : index
    %c0_10 = arith.constant 0 : index
    %21 = vector.load %arg4[%c0_9, %c1, %c0_10] : memref<1x2x4xf32, #tpu.memory_space<vmem>>, vector<1x1x4xf32>
    %22 = vector.shape_cast %21 : vector<1x1x4xf32> to vector<1x4xf32>
    %23 = vector.shape_cast %20 : vector<1x4xf32> to vector<1x1x4xf32>
    tpu.vector_store %arg4[%c0_9, %c1, %c0_10], %23 {strides = array<i32>} : memref<1x2x4xf32, #tpu.memory_space<vmem>>, vector<1x1x4xf32>,
    %c0_11 = arith.constant 0 : index
    %c0_12 = arith.constant 0 : index
    %24 = vector.load %arg3[%c0_11, %c0_12] : memref<4x16xbf16, #tpu.memory_space<vmem>>, vector<4x16xbf16>
    %cst_13 = arith.constant dense<0.000000e+00> : vector<96x16xf32>
    %25 = tpu.matmul %10, %24, %cst_13 {dimension_numbers = #tpu.dot_dimension_numbers<[1], [0], [0], [1], [0, 0, 1, 1], [], []>} : vector<96x4xbf16>, vector<4x16xbf16>, vector<96x16xf32> -> vector<96x16xf32>
    %cst_14 = arith.constant dense<0.000000e+00> : vector<16xf32>
    %26 = vector.multi_reduction <add>, %25, %cst_14 [0] : vector<96x16xf32> to vector<16xf32>
    %27 = vector.shape_cast %26 : vector<16xf32> to vector<1x16xf32>
    %c0_15 = arith.constant 0 : index
    %c0_16 = arith.constant 0 : index
    %c0_17 = arith.constant 0 : index
    %28 = vector.load %arg5[%c0_15, %c0_16, %c0_17] : memref<1x2x16xf32, #tpu.memory_space<vmem>>, vector<1x1x16xf32>
    %29 = vector.shape_cast %28 : vector<1x1x16xf32> to vector<1x16xf32>
    %30 = vector.shape_cast %27 : vector<1x16xf32> to vector<1x1x16xf32>
    tpu.vector_store %arg5[%c0_15, %c0_16, %c0_17], %30 {strides = array<i32>} : memref<1x2x16xf32, #tpu.memory_space<vmem>>, vector<1x1x16xf32>,
    %31 = arith.mulf %25, %25 : vector<96x16xf32>
    %cst_18 = arith.constant dense<0.000000e+00> : vector<16xf32>
    %32 = vector.multi_reduction <add>, %31, %cst_18 [0] : vector<96x16xf32> to vector<16xf32>
    %33 = vector.shape_cast %32 : vector<16xf32> to vector<1x16xf32>
    %c0_19 = arith.constant 0 : index
    %c1_20 = arith.constant 1 : index
    %c0_21 = arith.constant 0 : index
    %34 = vector.load %arg5[%c0_19, %c1_20, %c0_21] : memref<1x2x16xf32, #tpu.memory_space<vmem>>, vector<1x1x16xf32>
    %35 = vector.shape_cast %34 : vector<1x1x16xf32> to vector<1x16xf32>
    %36 = vector.shape_cast %33 : vector<1x16xf32> to vector<1x1x16xf32>
    tpu.vector_store %arg5[%c0_19, %c1_20, %c0_21], %36 {strides = array<i32>} : memref<1x2x16xf32, #tpu.memory_space<vmem>>, vector<1x1x16xf32>,
    return
  }
  func.func @transform_0(%arg0: i32) -> (i32, i32) {
    %c0_i32 = arith.constant 0 : i32
    %c0_i32_0 = arith.constant 0 : i32
    return %arg0, %c0_i32 : i32, i32
  }
  func.func @transform_1(%arg0: i32) -> (i32, i32) {
    %c0_i32 = arith.constant 0 : i32
    %c0_i32_0 = arith.constant 0 : i32
    %c0_i32_1 = arith.constant 0 : i32
    return %c0_i32, %c0_i32_0 : i32, i32
  }
  func.func @transform_2(%arg0: i32) -> (i32, i32) {
    %c0_i32 = arith.constant 0 : i32
    %c0_i32_0 = arith.constant 0 : i32
    %c0_i32_1 = arith.constant 0 : i32
    return %c0_i32, %c0_i32_0 : i32, i32
  }
  func.func @transform_3(%arg0: i32) -> (i32, i32, i32) {
    %c0_i32 = arith.constant 0 : i32
    %c0_i32_0 = arith.constant 0 : i32
    %c0_i32_1 = arith.constant 0 : i32
    return %arg0, %c0_i32, %c0_i32_0 : i32, i32, i32
  }
  func.func @transform_4(%arg0: i32) -> (i32, i32, i32) {
    %c0_i32 = arith.constant 0 : i32
    %c0_i32_0 = arith.constant 0 : i32
    %c0_i32_1 = arith.constant 0 : i32
    return %arg0, %c0_i32, %c0_i32_0 : i32, i32, i32
  }
}

</mosaic_0001>

<bundles_post_ra>
// kernel: tpu_custom_call.1
= control target key start
LH: loop header
LB: loop body
LE: loop exit
PB: predicated region body
PF: predicated region fallthrough
CT: control target
= control target key end

     0   :  { %10 = vsyncpa [#allocation3], 0  ;;  %s1107_s0 = inlined_call_operand.vmem [shape: bf16[512,4], index: 0, kind: input, shape index: {}]   ;;  %s1108_s1 = inlined_call_operand.vmem [shape: bf16[4,4], index: 1, kind: input, shape index: {}]   ;;  %s1109_s2 = inlined_call_operand.vmem [shape: bf16[4,16], index: 2, kind: input, shape index: {}]   ;;  %s1110_s3 = inlined_call_operand.vmem [shape: f32[6,2,4], index: 3, kind: output, shape index: {0}]   ;;  %s1111_s4 = inlined_call_operand.hbm [shape: f32[6,2,16], index: 4, kind: output, shape index: {1}]  }
   0x1   :  { %12 = vsyncpa [#allocation3 + $0x1], 0  ;;  %s871_s15 = smov 0   ;;  %s873_s16 = smov 0  }
   0x2   :  { %s875_s17 = smov 0   ;;  %s877_s18 = smov 0  }
   0x3 LB: > { %s892_s19 = sadd.s32 4294967295, %s844_s18   ;;  %s718_s20 = sadd.s32 4294967294, %s844_s18   ;;  %s844_s18 = sphi %s877_s18, %s1119_s18   ;;  %s840_s17 = sphi %s875_s17, %s1118_s17   ;;  %s836_s16 = sphi %s873_s16, %s1117_s16   ;;  %s832_s15 = sphi %s871_s15, %s1116_s15  }
   0x4   : > { %s896_s21 = sadd.s32 1, %s844_s18   ;;  %s119_s22 = sadd.s32 1, %s840_s17 }
   0x5   : > { %s116_s23 = ssub.s32 %s844_s18, %s896_s21  ;;  %p129_p0 = scmp.ne.s32.totalorder %s840_s17, %s836_s16 }
   0x6   : > { %p117_p1 = scmp.eq.s32.totalorder %s116_s23, 0  ;;  %p130_p2 = scmp.eq.s32.totalorder %s892_s19, 5 }
   0x7   : > { %p135_p3 = scmp.ne.s32.totalorder %s836_s16, %s832_s15  ;;  %p136_p4 = scmp.eq.s32.totalorder %s718_s20, 5 }
   0x8   : > { %s907_s24 = scalar_select %p117_p1, %s840_s17, %s119_s22  }
   0x9   : > { %p909_p5 = por %p130_p2, %p129_p0  ;;  %p913_p6 = por %p136_p4, %p135_p3 }
   0xa   : > { %p721_p7 = scmp.ge.s32.totalorder %s844_s18, 1  ;;  %p177_p8 = scmp.lt.s32.totalorder %s844_s18, 7 }
   0xc   : > { %p178_p9 = pnand %p721_p7, %p177_p8 }
   0xd   : > { %s211_s5 = smul.u32 (!%p178_p9), 12, %s892_s19  ;;  %p225_p11 = scmp.lt.s32.totalorder (!%p178_p9), %s892_s19, 5 }
   0xe   : > { %181 = sbr.rel (%p178_p9) target bundleno = 234 (0xea), region = 32  ;;  %s208_s11 = sand.u32 (!%p178_p9), 1, %s836_s16  }
   0xf   : > { %s255_s6 = smul.u32 (!%p178_p9), 96, %s892_s19  ;;  %p216_p10 = scmp.lt.s32.totalorder (!%p178_p9), %s211_s5, 63 }
  0x10   : > { %s722_s13 = sshll.u32 (!%p178_p9), %s208_s11, 1  ;;  %s738_s14 = sshll.u32 (!%p178_p9), %s892_s19, 1 }
  0x11   : > { %s630_s27 = scalar_lea.hbm (!%p178_p9), %s1111_s4, %s738_s14 }
  0x13   : > { %v329_v0 = vld [vmem:[%s1108_s1] sm:$0x3]  ;;  %vm379_vm0 = vcmask 1041408   ;;  %v242_v2 = vlaneseq  ;;  %v929_v6 = vstv %s255_s6  ;;  %s1121_s5 = smov (!%p216_p10, %s211_s5), 63  ;;  %vm360_vm9 = vcmask 31744   ;;  %s634_s6 = sshll.u32 %s630_s27, 4  ;;  %s635_s6 = int_to_ptr.hbm [resolvable:$true] %s634_s6 }
  0x14   : > { %v495_v1 = vld [vmem:[%s1109_s2] sm:$0x3]  ;;  %v381_v3 = vsel %vm379_vm0, %v329_v0, 0  ;;  %s723_s7 = sshll.u32 %s1121_s5, 2  ;;  %s796_s8 = sshra.s32 %s635_s6, 4  ;;  %s797_s8 = int_to_ptr.hbm [resolvable:$true] %s796_s8 }
  0x15   : > { %v497_v4 = vsel %vm379_vm0, %v495_v1, 0  ;;  %390 = vmatpush.bf16.msra.mxu0 %v381_v3  ;;  %741 = vmatpush.bf16.msra.mxu2 %v381_v3  ;;  %v927_v5 = vshrl.u32 %v242_v2, 7  ;;  %s944_s10 = scalar_lea.vmem %s1107_s0, %s723_s7  ;;  %s617_s7 = scalar_lea.sflag [#allocation3], %s208_s11 }
  0x16   : > { %506 = vmatpush.bf16.msra.mxu1 %v497_v4  ;;  %742 = vmatpush.bf16.msra.mxu3 %v497_v4  ;;  %v230_v18 = vld [vmem:[%s944_s10] sm:$0xf]  ;;  %v231_v19 = vld [vmem:[%s944_s10 + $0x4] sm:$0xf]  ;;  %v236_v21 = vld [vmem:[%s944_s10 + $0x18] sm:$0xf]  ;;  %p803_p1 = scmp.lt.s32.totalorder %s797_s8, %s1111_s4 }
  0x17   : > { %v244_v7 = vadd.s32 8, %v927_v5  ;;  %v257_v8 = vadd.s32 %v929_v6, %v927_v5  ;;  %v249_v9 = vadd.s32 48, %v927_v5  ;;  %v250_v10 = vadd.s32 56, %v927_v5  ;;  %v237_v22 = vld [vmem:[%s944_s10 + $0x1c] sm:$0xf]  ;;  %s226_s12 = scalar_select %p225_p11, %s892_s19, 5 }
  0x18   : > { %v245_v11 = vadd.s32 16, %v927_v5  ;;  %v246_v12 = vadd.s32 24, %v927_v5  ;;  %v251_v16 = vadd.s32 64, %v927_v5  ;;  %v252_v17 = vadd.s32 72, %v927_v5  ;;  %v232_v37 = vld [vmem:[%s944_s10 + $0x8] sm:$0xf] }
  0x19   : > { %v258_v13 = vadd.s32 %v929_v6, %v244_v7  ;;  %vm269_vm1 = vcmp.lt.s32.totalorder %v257_v8, 512  ;;  %v263_v14 = vadd.s32 %v929_v6, %v249_v9  ;;  %v264_v15 = vadd.s32 %v929_v6, %v250_v10  ;;  %v233_v38 = vld [vmem:[%s944_s10 + $0xc] sm:$0xf]  ;;  %v238_v39 = vld [vmem:[%s944_s10 + $0x20] sm:$0xf]  ;;  %s724_s20 = sshll.u32 %s226_s12, 1 }
  0x1a   : > { %vm305_vm2 = vmpackc.low %vm269_vm1, %vm269_vm1  ;;  %v259_v23 = vadd.s32 %v929_v6, %v245_v11  ;;  %v260_v26 = vadd.s32 %v929_v6, %v246_v12  ;;  %v265_v29 = vadd.s32 %v929_v6, %v251_v16  ;;  %v266_v32 = vadd.s32 %v929_v6, %v252_v17  ;;  %v239_v40 = vld [vmem:[%s944_s10 + $0x24] sm:$0xf]  ;;  %v234_v59 = vld [vmem:[%s944_s10 + $0x10] sm:$0xf]  ;;  %s228_s30 = scalar_lea.vmem %s1110_s3, %s724_s20  ;;  %s210_s19 = scalar_lea.vmem [#allocation2], %s722_s13 }
  0x1b   : > { %vm270_vm3 = vcmp.lt.s32.totalorder %v258_v13, 512  ;;  %vm275_vm4 = vcmp.lt.s32.totalorder %v263_v14, 512  ;;  %v317_v20 = vsel %vm305_vm2, %v230_v18, 0  ;;  %vm276_vm6 = vcmp.lt.s32.totalorder %v264_v15, 512  ;;  %v235_v60 = vld [vmem:[%s944_s10 + $0x14] sm:$0xf] }
  0x1c   : > { %vm306_vm5 = vmpackc.low %vm270_vm3, %vm270_vm3  ;;  %v342_v25 = vunpack.c.l.b16 %v317_v20  ;;  %vm271_vm10 = vcmp.lt.s32.totalorder %v259_v23, 512  ;;  %vm272_vm11 = vcmp.lt.s32.totalorder %v260_v26, 512  ;;  %vm277_vm12 = vcmp.lt.s32.totalorder %v265_v29, 512  ;;  %v240_v61 = vld [vmem:[%s944_s10 + $0x28] sm:$0xf]  ;;  %s632_s5 = sshll.u32 %s210_s19, 4  ;;  %s633_s5 = int_to_ptr.vmem [resolvable:$true] %s632_s5 }
  0x1d   : > { %v318_v24 = vsel %vm306_vm5, %v231_v19, 0  ;;  %vm311_vm7 = vmpackc.low %vm275_vm4, %vm275_vm4  ;;  %vm278_vm14 = vcmp.lt.s32.totalorder %v266_v32, 512  ;;  %v247_v43 = vadd.s32 32, %v927_v5  ;;  %v248_v46 = vadd.s32 40, %v927_v5  ;;  %v241_v62 = vld [vmem:[%s944_s10 + $0x2c] sm:$0xf] }
  0x1e   : > { %v343_v27 = vunpack.c.l.b16 %v318_v24  ;;  %vm312_vm8 = vmpackc.low %vm276_vm6, %vm276_vm6  ;;  %v323_v28 = vsel %vm311_vm7, %v236_v21, 0  ;;  %v253_v49 = vadd.s32 80, %v927_v5  ;;  %v254_v50 = vadd.s32 88, %v927_v5  ;;  %s798_s9 = scalar_lea.hbm %s797_s8, 2  ;;  %s802_s13 = scalar_lea.hbm %s1111_s4, 12 }
  0x1f   : > { %v324_v30 = vsel %vm312_vm8, %v237_v22, 0  ;;  %v348_v31 = vunpack.c.l.b16 %v323_v28  ;;  %vm958_vm13 = vmpackc.low %vm271_vm10, %vm271_vm10  ;;  %v261_v53 = vadd.s32 %v929_v6, %v247_v43  ;;  %v262_v54 = vadd.s32 %v929_v6, %v248_v46  ;;  %p799_p12 = scmp.ne.s32.totalorder %s797_s8, %s798_s9  ;;  %p804_p2 = scmp.lt.s32.totalorder %s802_s13, %s798_s9 }
  0x20   : > { %v354_v33 = vpack.c.b16 %v343_v27, %v342_v25  ;;  %v349_v34 = vunpack.c.l.b16 %v324_v30  ;;  %vm308_vm15 = vmpackc.low %vm272_vm11, %vm272_vm11  ;;  %v319_v41 = vsel %vm958_vm13, %v232_v37, 0  ;;  %v267_v56 = vadd.s32 %v929_v6, %v253_v49 }
  0x21   : > { %vm313_vm0 = vmpackc.low %vm277_vm12, %vm277_vm12  ;;  %v320_v42 = vsel %vm308_vm15, %v233_v38, 0  ;;  %v344_v47 = vunpack.c.l.b16 %v319_v41  ;;  %v268_v57 = vadd.s32 %v929_v6, %v254_v50  ;;  %vm273_vm2 = vcmp.lt.s32.totalorder %v261_v53, 512  ;;  %p800_p13 = pnand %p799_p12, %p909_p5  ;;  %p805_p3 = por %p804_p2, %p803_p1 }
  0x22   : > { %725 = vmatmul.msk.bf16.vlgmr.msra.gmra.mxu0 %vm360_vm9, %v354_v33  ;;  %v357_v35 = vpack.c.b16 %v349_v34, %v348_v31  ;;  %731 = vmatmul.msk.bf16.vlgmr.msra.gmra.mxu1 %vm360_vm9, %v354_v33  ;;  %vm314_vm1 = vmpackc.low %vm278_vm14, %vm278_vm14  ;;  %v325_v44 = vsel %vm313_vm0, %v238_v39, 0  ;;  %v345_v48 = vunpack.c.l.b16 %v320_v42  ;;  %vm274_vm3 = vcmp.lt.s32.totalorder %v262_v54, 512 }
  0x23   : > { %v326_v45 = vsel %vm314_vm1, %v239_v40, 0  ;;  %v350_v51 = vunpack.c.l.b16 %v325_v44  ;;  %vm279_vm4 = vcmp.lt.s32.totalorder %v267_v56, 512  ;;  %vm309_vm5 = vmpackc.low %vm273_vm2, %vm273_vm2  ;;  %vm280_vm6 = vcmp.lt.s32.totalorder %v268_v57, 512  ;;  %p801_p0 = pneg %p800_p13 }
  0x24   : > { %728 = vmatmul.msk.bf16.vlgmr.msra.gmra.mxu2 %vm360_vm9, %v357_v35  ;;  %734 = vmatmul.msk.bf16.vlgmr.msra.gmra.mxu3 %vm360_vm9, %v357_v35  ;;  %v351_v52 = vunpack.c.l.b16 %v326_v45  ;;  %v355_v55 = vpack.c.b16 %v345_v48, %v344_v47  ;;  %vm310_vm7 = vmpackc.low %vm274_vm3, %vm274_vm3  ;;  %v321_v63 = vsel %vm309_vm5, %v234_v59, 0  ;;  %vm538_vm11 = vcmask 130048  }
  0x25   : > { %vm315_vm8 = vmpackc.low %vm279_vm4, %vm279_vm4  ;;  %v322_v0 = vsel %vm310_vm7, %v235_v60, 0  ;;  %v346_v3 = vunpack.c.l.b16 %v321_v63  ;;  %vm568_vm12 = vcmask 122880   ;;  %p806_p4 = pnand %p805_p3, %p801_p0 }
  0x26   : > { %v358_v58 = vpack.c.b16 %v351_v52, %v350_v51  ;;  %vm316_vm10 = vmpackc.low %vm280_vm6, %vm280_vm6  ;;  %v327_v1 = vsel %vm315_vm8, %v240_v61, 0  ;;  %v347_v4 = vunpack.c.l.b16 %v322_v0 }
  0x27   : > { %v328_v2 = vsel %vm316_vm10, %v241_v62, 0  ;;  %v352_v5 = vunpack.c.l.b16 %v327_v1 }
  0x28   : > { %v353_v6 = vunpack.c.l.b16 %v328_v2  ;;  %v356_v7 = vpack.c.b16 %v347_v4, %v346_v3 }
  0x2a   : > { %v359_v8 = vpack.c.b16 %v353_v6, %v352_v5 }
  0x32   : > { %726 = vmatmul.msk.bf16.gmra.mxu0 %vm360_vm9, %v355_v55  ;;  %732 = vmatmul.msk.bf16.gmra.mxu1 %vm360_vm9, %v355_v55 }
  0x34   : > { %729 = vmatmul.msk.bf16.gmra.mxu2 %vm360_vm9, %v358_v58  ;;  %735 = vmatmul.msk.bf16.gmra.mxu3 %vm360_vm9, %v358_v58 }
  0x42   : > { %727 = vmatmul.msk.bf16.gmra.mxu0 %vm360_vm9, %v356_v7  ;;  %733 = vmatmul.msk.bf16.gmra.mxu1 %vm360_vm9, %v356_v7 }
  0x44   : > { %730 = vmatmul.msk.bf16.gmra.mxu2 %vm360_vm9, %v359_v8  ;;  %736 = vmatmul.msk.bf16.gmra.mxu3 %vm360_vm9, %v359_v8 }
  0x9f   : > { %v392_v9 = vpop.f32.mrf.mxu0  ;;  %v508_v10 = vpop.f32.mrf.mxu1 }
  0xa0   : > { %v453_v24 = vmul.f32 %v392_v9, %v392_v9  ;;  %v570_v25 = vmul.f32 %v508_v10, %v508_v10  ;;  %v422_v28 = vsel %vm360_vm9, %v392_v9, 0.0  ;;  %v539_v30 = vsel %vm538_vm11, %v508_v10, 0.0 }
  0xa2   : > { %v465_v34 = vsel %vm360_vm9, %v453_v24, 0.0  ;;  %v582_v35 = vsel %vm538_vm11, %v570_v25, 0.0 }
  0xa7   : > { %v407_v11 = vpop.f32.mrf.mxu2  ;;  %v523_v12 = vpop.f32.mrf.mxu3 }
  0xa8   : > { %v394_v13 = vpop.f32.mrf.mxu0  ;;  %v510_v14 = vpop.f32.mrf.mxu1  ;;  %v459_v26 = vmul.f32 %v407_v11, %v407_v11  ;;  %v576_v29 = vmul.f32 %v523_v12, %v523_v12  ;;  %v433_v38 = vsel %vm360_vm9, %v407_v11, 0.0  ;;  %v550_v40 = vsel %vm538_vm11, %v523_v12, 0.0 }
  0xa9   : > { %v454_v23 = vmul.f32 %v394_v13, %v394_v13  ;;  %v571_v27 = vmul.f32 %v510_v14, %v510_v14  ;;  %v423_v31 = vsel %vm360_vm9, %v394_v13, 0.0  ;;  %v540_v33 = vsel %vm538_vm11, %v510_v14, 0.0 }
  0xaa   : > { %v1003_v39 = vsel %vm360_vm9, %v459_v26, 0.0  ;;  %v1012_v44 = vsel %vm538_vm11, %v576_v29, 0.0  ;;  %v424_v45 = vadd.f32 %v423_v31, %v422_v28  ;;  %v541_v47 = vadd.f32 %v540_v33, %v539_v30 }
  0xab   : > { %v466_v32 = vsel %vm360_vm9, %v454_v23, 0.0  ;;  %v583_v41 = vsel %vm538_vm11, %v571_v27, 0.0 }
  0xac   : > { %v467_v46 = vadd.f32 %v466_v32, %v465_v34  ;;  %v584_v54 = vadd.f32 %v583_v41, %v582_v35 }
  0xaf   : > { %v409_v15 = vpop.f32.mrf.mxu2  ;;  %v525_v16 = vpop.f32.mrf.mxu3 }
  0xb0   : > { %v397_v17 = vpop.f32.mrf.mxu0  ;;  %v513_v18 = vpop.f32.mrf.mxu1  ;;  %v460_v55 = vmul.f32 %v409_v15, %v409_v15  ;;  %v435_v62 = vsel %vm360_vm9, %v409_v15, 0.0  ;;  %v552_v63 = vsel %vm538_vm11, %v525_v16, 0.0  ;;  %v577_v11 = vmul.f32 %v525_v16, %v525_v16 }
  0xb1   : > { %v455_v36 = vmul.f32 %v397_v17, %v397_v17  ;;  %v572_v37 = vmul.f32 %v513_v18, %v513_v18  ;;  %v425_v50 = vsel %vm360_vm9, %v397_v17, 0.0  ;;  %v542_v51 = vsel %vm538_vm11, %v513_v18, 0.0 }
  0xb2   : > { %v426_v0 = vadd.f32 %v425_v50, %v424_v45  ;;  %v543_v1 = vadd.f32 %v542_v51, %v541_v47  ;;  %v478_v10 = vsel %vm360_vm9, %v460_v55, 0.0 }
  0xb3   : > { %v468_v56 = vsel %vm360_vm9, %v455_v36, 0.0  ;;  %v585_v57 = vsel %vm538_vm11, %v572_v37, 0.0 }
  0xb4   : > { %v469_v6 = vadd.f32 %v468_v56, %v467_v46  ;;  %v586_v7 = vadd.f32 %v585_v57, %v584_v54  ;;  %v595_v46 = vsel %vm538_vm11, %v577_v11, 0.0 }
  0xb7   : > { %v990_v19 = vpop.f32.mrf.mxu2  ;;  %v992_v20 = vpop.f32.mrf.mxu3 }
  0xb8   : > { %v399_v21 = vpop.f32.mrf.mxu0  ;;  %v515_v22 = vpop.f32.mrf.mxu1  ;;  %v461_v32 = vmul.f32 %v990_v19, %v990_v19  ;;  %v578_v33 = vmul.f32 %v992_v20, %v992_v20  ;;  %v437_v47 = vsel %vm360_vm9, %v990_v19, 0.0 }
  0xb9   : > { %v456_v52 = vmul.f32 %v399_v21, %v399_v21  ;;  %v573_v53 = vmul.f32 %v515_v22, %v515_v22  ;;  %v427_v58 = vsel %vm360_vm9, %v399_v21, 0.0  ;;  %v544_v59 = vsel %vm538_vm11, %v515_v22, 0.0 }
  0xba   : > { %v428_v8 = vadd.f32 %v427_v58, %v426_v0  ;;  %v545_v9 = vadd.f32 %v544_v59, %v543_v1  ;;  %v597_v54 = vsel %vm538_vm11, %v578_v33, 0.0 }
  0xbb   : > { %v470_v2 = vsel %vm360_vm9, %v456_v52, 0.0  ;;  %v587_v3 = vsel %vm538_vm11, %v573_v53, 0.0  ;;  %v554_v53 = vsel %vm538_vm11, %v992_v20, 0.0 }
  0xbc   : > { %v471_v17 = vadd.f32 %v470_v2, %v469_v6  ;;  %v588_v18 = vadd.f32 %v587_v3, %v586_v7 }
  0xbf   : > { %v1007_v42 = vpop.f32.mrf.mxu2  ;;  %v1009_v43 = vpop.f32.mrf.mxu3 }
  0xc0   : > { %v402_v48 = vpop.f32.mrf.mxu0  ;;  %v518_v49 = vpop.f32.mrf.mxu1  ;;  %v439_v19 = vsel %vm360_vm9, %v1007_v42, 0.0  ;;  %v556_v55 = vsel %vm538_vm11, %v1009_v43, 0.0 }
  0xc1   : > { %v457_v60 = vmul.f32 %v402_v48, %v402_v48  ;;  %v574_v61 = vmul.f32 %v518_v49, %v518_v49  ;;  %v429_v4 = vsel %vm360_vm9, %v402_v48, 0.0  ;;  %v546_v5 = vsel %vm538_vm11, %v518_v49, 0.0 }
  0xc2   : > { %v430_v21 = vadd.f32 %v429_v4, %v428_v8  ;;  %v547_v22 = vadd.f32 %v546_v5, %v545_v9  ;;  %v462_v48 = vmul.f32 %v1007_v42, %v1007_v42  ;;  %v579_v49 = vmul.f32 %v1009_v43, %v1009_v43 }
  0xc3   : > { %v472_v12 = vsel %vm360_vm9, %v457_v60, 0.0  ;;  %v589_v13 = vsel %vm538_vm11, %v574_v61, 0.0 }
  0xc4   : > { %v473_v29 = vadd.f32 %v472_v12, %v471_v17  ;;  %v590_v16 = vadd.f32 %v589_v13, %v588_v18  ;;  %v599_v20 = vsel %vm538_vm11, %v579_v49, 0.0 }
  0xc7   : > { %v417_v14 = vpop.f32.mrf.mxu2  ;;  %v533_v15 = vpop.f32.mrf.mxu3 }
  0xc8   : > { %v404_v23 = vpop.f32.mrf.mxu0  ;;  %v520_v24 = vpop.f32.mrf.mxu1  ;;  %v463_v60 = vmul.f32 %v417_v14, %v417_v14  ;;  %v580_v61 = vmul.f32 %v533_v15, %v533_v15  ;;  %v441_v42 = vsel %vm360_vm9, %v417_v14, 0.0  ;;  %v558_v4 = vsel %vm538_vm11, %v533_v15, 0.0 }
  0xc9   : > { %v431_v25 = vsel %vm360_vm9, %v404_v23, 0.0  ;;  %v458_v26 = vmul.f32 %v404_v23, %v404_v23  ;;  %v548_v27 = vsel %vm538_vm11, %v520_v24, 0.0  ;;  %v575_v28 = vmul.f32 %v520_v24, %v520_v24 }
  0xca   : > { %v432_v30 = vadd.f32 %v431_v25, %v430_v21  ;;  %v549_v31 = vadd.f32 %v548_v27, %v547_v22  ;;  %v484_v8 = vsel %vm360_vm9, %v463_v60, 0.0  ;;  %v601_v9 = vsel %vm538_vm11, %v580_v61, 0.0 }
  0xcb   : > { %v474_v34 = vsel %vm360_vm9, %v458_v26, 0.0  ;;  %v591_v35 = vsel %vm538_vm11, %v575_v28, 0.0 }
  0xcc   : > { %v434_v36 = vadd.f32 %v433_v38, %v432_v30  ;;  %v475_v37 = vadd.f32 %v474_v34, %v473_v29  ;;  %v551_v41 = vadd.f32 %v550_v40, %v549_v31  ;;  %v592_v45 = vadd.f32 %v591_v35, %v590_v16 }
  0xcd   : > { %v480_v40 = vsel %vm360_vm9, %v461_v32, 0.0 }
  0xce   : > { %v436_v50 = vadd.f32 %v435_v62, %v434_v36  ;;  %v477_v51 = vadd.f32 %v1003_v39, %v475_v37  ;;  %v553_v52 = vadd.f32 %v552_v63, %v551_v41  ;;  %v594_v38 = vadd.f32 %v1012_v44, %v592_v45 }
  0xcf   : > { %v419_v58 = vpop.f32.mrf.mxu2  ;;  %v535_v59 = vpop.f32.mrf.mxu3  ;;  %v482_v44 = vsel %vm360_vm9, %v462_v48, 0.0 }
  0xd0   : > { %v479_v56 = vadd.f32 %v478_v10, %v477_v51  ;;  %v596_v57 = vadd.f32 %v595_v46, %v594_v38  ;;  %v438_v39 = vadd.f32 %v437_v47, %v436_v50  ;;  %v555_v62 = vadd.f32 %v554_v53, %v553_v52 }
  0xd1   : > { %v464_v2 = vmul.f32 %v419_v58, %v419_v58  ;;  %v581_v3 = vmul.f32 %v535_v59, %v535_v59  ;;  %v443_v10 = vsel %vm360_vm9, %v419_v58, 0.0  ;;  %v560_v14 = vsel %vm538_vm11, %v535_v59, 0.0 }
  0xd2   : > { %v440_v63 = vadd.f32 %v439_v19, %v438_v39  ;;  %v481_v0 = vadd.f32 %v480_v40, %v479_v56  ;;  %v598_v1 = vadd.f32 %v597_v54, %v596_v57  ;;  %v557_v43 = vadd.f32 %v556_v55, %v555_v62 }
  0xd3   : > { %v486_v15 = vsel %vm360_vm9, %v464_v2, 0.0  ;;  %v603_v21 = vsel %vm538_vm11, %v581_v3, 0.0  ;;  %vm451_vm9 = vcmask 24576  }
  0xd4   : > { %v442_v5 = vadd.f32 %v441_v42, %v440_v63  ;;  %v483_v6 = vadd.f32 %v482_v44, %v481_v0  ;;  %v600_v7 = vadd.f32 %v599_v20, %v598_v1  ;;  %v559_v11 = vadd.f32 %v558_v4, %v557_v43 }
  0xd6   : > { %v444_v12 = vadd.f32 %v443_v10, %v442_v5  ;;  %v485_v13 = vadd.f32 %v484_v8, %v483_v6  ;;  %v602_v17 = vadd.f32 %v601_v9, %v600_v7  ;;  %v561_v18 = vadd.f32 %v560_v14, %v559_v11 }
  0xd8   : > { %v445_v22 = vrot.slane %v444_v12, 4  ;;  %v487_v23 = vadd.f32 %v486_v15, %v485_v13  ;;  %v604_v24 = vadd.f32 %v603_v21, %v602_v17  ;;  %v562_v25 = vrot.slane %v561_v18, 4 }
  0xda   : > { %v446_v26 = vadd.f32 %v445_v22, %v444_v12  ;;  %v488_v27 = vrot.slane %v487_v23, 4  ;;  %v605_v28 = vrot.slane %v604_v24, 4  ;;  %v563_v29 = vadd.f32 %v562_v25, %v561_v18 }
  0xdc   : > { %v447_v16 = vrot.slane %v446_v26, 2  ;;  %v489_v30 = vadd.f32 %v488_v27, %v487_v23  ;;  %v606_v31 = vadd.f32 %v605_v28, %v604_v24  ;;  %v564_v32 = vrot.slane %v563_v29, 2 }
  0xde   : > { %v448_v33 = vadd.f32 %v447_v16, %v446_v26  ;;  %v490_v34 = vrot.slane %v489_v30, 2  ;;  %v607_v35 = vrot.slane %v606_v31, 2  ;;  %v565_v36 = vadd.f32 %v564_v32, %v563_v29 }
  0xe0   : > { %v449_v37 = vrot.slane %v448_v33, 1  ;;  %v491_v41 = vadd.f32 %v490_v34, %v489_v30  ;;  %v608_v45 = vadd.f32 %v607_v35, %v606_v31  ;;  %v566_v46 = vrot.slane %v565_v36, 1 }
  0xe2   : > { %v450_v47 = vadd.f32 %v449_v37, %v448_v33  ;;  %v492_v48 = vrot.slane %v491_v41, 1  ;;  %v609_v49 = vrot.slane %v608_v45, 1  ;;  %v567_v50 = vadd.f32 %v566_v46, %v565_v36 }
  0xe4   : > { %452 = vst.msk [vmem:[%s228_s30] sm:$0x1] %vm451_vm9, %v450_v47  ;;  %v493_v51 = vadd.f32 %v492_v48, %v491_v41  ;;  %v610_v52 = vadd.f32 %v609_v49, %v608_v45 }
  0xe5   : > { %569 = vst.msk [vmem:[%s210_s19] sm:$0x1] %vm568_vm12, %v567_v50 }
  0xe6   : > { %494 = vst.msk [vmem:[%s228_s30 + $0x1] sm:$0x1] %vm451_vm9, %v493_v51 }
  0xe7   : > { %611 = vst.msk [vmem:[%s210_s19 + $0x1] sm:$0x1] %vm568_vm12, %v610_v52 }
  0xe8   : > { %809 = shalt.err (!%p806_p4)
}
  0xe9   : > { %743 = dma.vmem_to_hbm [thread:$0]  (%p909_p5), %s633_s5, 32, %s635_s6, %s617_s7  }
  0xea PF: > { %p749_p7 = scmp.ge.s32.totalorder %s844_s18, 2  ;;  %s653_s11 = sand.u32 1, %s832_s15  }
  0xeb   : > { %s654_s22 = scalar_lea.sflag [#allocation3], %s653_s11 }
  0xec   : > { %p746_p8 = pnand %p749_p7, %p913_p6 }
  0xee   : > { %p747_p9 = pneg %p746_p8 }
  0xf0   : > { %827 = dma.done.wait (%p747_p9), %s654_s22, 32  }
  0xf1   : > { %829 = vsyncadd (%p747_p9), %s654_s22, 4294967264  ;;  %p15_p10 = scmp.ge.s32.totalorder %s896_s21, 8   ;;  %s1116_s15 = smov %s836_s16 }
  0xf2   : > { %s1117_s16 = smov %s840_s17  ;;  %s1118_s17 = smov %s907_s24 }
  0xf3   : > { %s1119_s18 = smov %s896_s21  ;;  %17 = sbr.rel (!%p15_p10) target bundleno = 3 (0x3), region = 79 }
  0xf8   :  { %660 = vsyncpa [#allocation3], 1 }
  0xf9   :  { %662 = vsyncpa [#allocation3 + $0x1], 1 }

</bundles_post_ra>
